<compile_context>
chip_gen: v6e
topology: v6e:2x2x1
jax: 0.10.0
libtpu: 0.0.40
codegen_flags: <defaults>
</compile_context>

<pallas_src>
import math

import jax
import jax.numpy as jnp
import numpy as np
from jax.experimental import pallas as pl
from jax.experimental.pallas import tpu as pltpu

_EPS = 1e-07
_INV_TMP = 10.0  # 1 / tmp, tmp = 0.1 in the reference implementation


def _concrete_dropout_linear_kernel(scalars_ref, x_ref, u_ref, w_ref, b_ref, out_ref):
    logit_p = scalars_ref[0]      # log(p + eps) - log(1 - p + eps)   (precomputed)
    inv_retain = scalars_ref[1]   # 1 / (1 - p)                        (precomputed)

    x = x_ref[...]                # (tm, F) f32
    u = u_ref[...]                # (tm, F) f32 uniform noise

    # Concrete dropout mask: one log + one sigmoid per element on the EUP,
    # everything else on the VPU.
    drop_logit = logit_p + jnp.log((u + _EPS) / (1.0 - u + _EPS))
    drop_prob = jax.nn.sigmoid(drop_logit * _INV_TMP)
    keep = (1.0 - drop_prob) * inv_retain
    x_drop = (x * keep).astype(jnp.bfloat16)

    # Wrapped layer: Linear on the MXU, bf16 operands, f32 accumulation.
    out = jnp.dot(x_drop, w_ref[...].astype(jnp.bfloat16),
                  preferred_element_type=jnp.float32)
    out_ref[...] = (out + b_ref[...]).astype(out_ref.dtype)


def concrete_dropout_linear(x, w_t, b, p_logit, noise_key,
                            weight_regulariser, dropout_regulariser,
                            block_m=512):
    """Returns (layer(concrete_dropout(x)), regularisation)."""
    B, F = x.shape
    O = w_t.shape[1]

    x = x.astype(jnp.float32)
    w_t = w_t.astype(jnp.float32)
    b2 = b.reshape(1, O).astype(jnp.float32)

    # torch.rand_like(x)
    u = jax.random.uniform(noise_key, (B, F), dtype=jnp.float32)

    # ---- p-dependent scalars, hoisted out of the kernel ----
    p = jax.nn.sigmoid(p_logit.astype(jnp.float32)).reshape(())
    logit_p = jnp.log(p + _EPS) - jnp.log(1.0 - p + _EPS)
    inv_retain = 1.0 / (1.0 - p)
    scalars = jnp.stack([logit_p, inv_retain]).astype(jnp.float32)

    # ---- regularisation (x-independent): plain XLA reductions in the wrapper ----
    sum_of_squares = jnp.sum(w_t * w_t) + jnp.sum(b2 * b2)
    weights_reg = weight_regulariser * sum_of_squares / (1.0 - p)
    dropout_reg = p * jnp.log(p) + (1.0 - p) * jnp.log(1.0 - p)
    dropout_reg = dropout_reg * (dropout_regulariser * F)   # x[0].numel()
    regularisation = weights_reg + dropout_reg

    # ---- batch-tiled grid ----
    # (8,128) rule: tm is either the full batch (small B) or a multiple of 8; last dims
    # (F, O) are the full array extents.  W/b index_maps are constant -> VMEM resident.
    tm = B if B <= block_m else block_m
    grid = (pl.cdiv(B, tm),)

    cost = pl.CostEstimate(
        flops=2 * B * F * O,
        transcendentals=2 * B * F,                         # 1 log + 1 sigmoid per elem
        bytes_accessed=4 * (2 * B * F + F * O + O + B * O))

    out = pl.pallas_call(
        _concrete_dropout_linear_kernel,
        out_shape=jax.ShapeDtypeStruct((B, O), jnp.float32),
        grid=grid,
        in_specs=[
            pl.BlockSpec(memory_space=pltpu.MemorySpace.SMEM),   # [logit_p, 1/(1-p)]
            pl.BlockSpec((tm, F), lambda i: (i, 0)),             # x  (batch tile)
            pl.BlockSpec((tm, F), lambda i: (i, 0)),             # u  (batch tile)
            pl.BlockSpec((F, O), lambda i: (0, 0)),              # W  (resident)
            pl.BlockSpec((1, O), lambda i: (0, 0)),              # b  (resident)
        ],
        out_specs=pl.BlockSpec((tm, O), lambda i: (i, 0)),
        compiler_params=pltpu.CompilerParams(
            dimension_semantics=("parallel",)),                  # 2 TCs on v7x
        cost_estimate=cost,
    )(scalars, x, u, w_t, b2)
    return out, regularisation


if __name__ == "__main__":
    key = jax.random.PRNGKey(0)
    kx, kw, kb, knoise = jax.random.split(key, 4)

    B, F, O = 2, 32, 32
    weight_regulariser = 1e-6
    dropout_regulariser = 1e-5

    # deterministic inputs / parameters
    x = jax.random.normal(kx, (B, F), dtype=jnp.float32)
    w = jax.random.normal(kw, (O, F), dtype=jnp.float32) * (1.0 / math.sqrt(F))  # nn.Linear weight (out, in)
    b = jax.random.normal(kb, (O,), dtype=jnp.float32) * 0.01                    # nn.Linear bias (out,)
    w_t = w.T                                                                     # (in, out) for the kernel

    # __init__ with init_min == init_max == 0.1  =>  p_logit = logit(0.1) exactly
    p_logit = jnp.asarray([math.log(0.1) - math.log(1.0 - 0.1)], dtype=jnp.float32)

    out, reg = concrete_dropout_linear(
        x, w_t, b, p_logit, knoise,
        weight_regulariser=weight_regulariser,
        dropout_regulariser=dropout_regulariser)
    out = jax.block_until_ready(out)
    reg = jax.block_until_ready(reg)

    # ---- reference forward with the exact same noise (f32 matmul) ----
    u = jax.random.uniform(knoise, (B, F), dtype=jnp.float32)
    p_ref = 1.0 / (1.0 + math.exp(-(math.log(0.1) - math.log(0.9))))
    drop_logit_ref = (math.log(p_ref + 1e-7) - math.log(1.0 - p_ref + 1e-7)
                      + jnp.log(u + 1e-7) - jnp.log(1.0 - u + 1e-7))
    x_drop_ref = x * (1.0 - jax.nn.sigmoid(drop_logit_ref / 0.1)) / (1.0 - p_ref)
    out_ref = x_drop_ref @ w.T + b
    np.testing.assert_allclose(np.asarray(out), np.asarray(out_ref), rtol=2e-2, atol=2e-2)

    # ---- regularisation check (noise independent, analytical) ----
    ssq = float(jnp.sum(w * w) + jnp.sum(b * b))
    weights_reg_ref = weight_regulariser * ssq / (1.0 - p_ref)
    dropout_reg_ref = (p_ref * math.log(p_ref)
                       + (1.0 - p_ref) * math.log(1.0 - p_ref)) * dropout_regulariser * F
    np.testing.assert_allclose(float(reg), weights_reg_ref + dropout_reg_ref,
                               rtol=1e-4, atol=1e-6)
    assert out.shape == (B, O) and bool(jnp.all(jnp.isfinite(out)))

    print("KERNEL_OK")
</pallas_src>

<mosaic_0001>
module attributes {stable_mosaic.version = 11 : i64} {
  func.func @_concrete_dropout_linear_kernel(%arg0: i32, %arg1: memref<2xf32, #tpu.memory_space<smem>>, %arg2: memref<2x32xf32, #tpu.memory_space<vmem>>, %arg3: memref<2x32xf32, #tpu.memory_space<vmem>>, %arg4: memref<32x32xf32, #tpu.memory_space<vmem>>, %arg5: memref<1x32xf32, #tpu.memory_space<vmem>>, %arg6: memref<2x32xf32, #tpu.memory_space<vmem>>) attributes {dimension_semantics = [#tpu.dimension_semantics<parallel>], iteration_bounds = array<i64: 1>, scalar_prefetch = 0 : i64, scratch_operands = 0 : i64, tpu.core_type = #tpu.core_type<tc>, window_params = [{transform_indices = @transform_0, window_bounds = array<i64: 2>}, {transform_indices = @transform_1, window_bounds = array<i64: 2, 32>}, {transform_indices = @transform_2, window_bounds = array<i64: 2, 32>}, {pipeline_mode = #tpu.pipeline_mode<synchronous>, transform_indices = @transform_3, window_bounds = array<i64: 32, 32>}, {pipeline_mode = #tpu.pipeline_mode<synchronous>, transform_indices = @transform_4, window_bounds = array<i64: 1, 32>}, {transform_indices = @transform_5, window_bounds = array<i64: 2, 32>}]} {
    %c0 = arith.constant 0 : index
    %0 = memref.load %arg1[%c0] : memref<2xf32, #tpu.memory_space<smem>>
    %c1 = arith.constant 1 : index
    %1 = memref.load %arg1[%c1] : memref<2xf32, #tpu.memory_space<smem>>
    %c0_0 = arith.constant 0 : index
    %c0_1 = arith.constant 0 : index
    %2 = vector.load %arg2[%c0_0, %c0_1] : memref<2x32xf32, #tpu.memory_space<vmem>>, vector<2x32xf32>
    %c0_2 = arith.constant 0 : index
    %c0_3 = arith.constant 0 : index
    %3 = vector.load %arg3[%c0_2, %c0_3] : memref<2x32xf32, #tpu.memory_space<vmem>>, vector<2x32xf32>
    %cst = arith.constant 1.000000e-07 : f32
    %4 = vector.broadcast %cst : f32 to vector<2x32xf32>
    %5 = arith.addf %3, %4 : vector<2x32xf32>
    %cst_4 = arith.constant 1.000000e+00 : f32
    %6 = vector.broadcast %cst_4 : f32 to vector<2x32xf32>
    %7 = arith.subf %6, %3 : vector<2x32xf32>
    %cst_5 = arith.constant 1.000000e-07 : f32
    %8 = vector.broadcast %cst_5 : f32 to vector<2x32xf32>
    %9 = arith.addf %7, %8 : vector<2x32xf32>
    %10 = arith.divf %5, %9 : vector<2x32xf32>
    %11 = math.log %10 : vector<2x32xf32>
    %12 = vector.broadcast %0 : f32 to vector<2x32xf32>
    %13 = arith.addf %12, %11 : vector<2x32xf32>
    %cst_6 = arith.constant 1.000000e+01 : f32
    %14 = vector.broadcast %cst_6 : f32 to vector<2x32xf32>
    %15 = arith.mulf %13, %14 : vector<2x32xf32>
    %16 = arith.negf %15 : vector<2x32xf32>
    %17 = math.exp %16 : vector<2x32xf32>
    %cst_7 = arith.constant 1.000000e+00 : f32
    %18 = vector.broadcast %cst_7 : f32 to vector<2x32xf32>
    %19 = arith.addf %18, %17 : vector<2x32xf32>
    %20 = arith.divf %18, %19 : vector<2x32xf32>
    %cst_8 = arith.constant 1.000000e+00 : f32
    %21 = vector.broadcast %cst_8 : f32 to vector<2x32xf32>
    %22 = arith.subf %21, %20 : vector<2x32xf32>
    %23 = vector.broadcast %1 : f32 to vector<2x32xf32>
    %24 = arith.mulf %22, %23 : vector<2x32xf32>
    %25 = arith.mulf %2, %24 : vector<2x32xf32>
    %26 = arith.truncf %25 : vector<2x32xf32> to vector<2x32xbf16>
    %c0_9 = arith.constant 0 : index
    %c0_10 = arith.constant 0 : index
    %27 = vector.load %arg4[%c0_9, %c0_10] : memref<32x32xf32, #tpu.memory_space<vmem>>, vector<32x32xf32>
    %28 = arith.truncf %27 : vector<32x32xf32> to vector<32x32xbf16>
    %cst_11 = arith.constant dense<0.000000e+00> : vector<2x32xf32>
    %29 = tpu.matmul %26, %28, %cst_11 {dimension_numbers = #tpu.dot_dimension_numbers<[1], [0], [0], [1], [0, 0, 1, 1], [], []>} : vector<2x32xbf16>, vector<32x32xbf16>, vector<2x32xf32> -> vector<2x32xf32>
    %c0_12 = arith.constant 0 : index
    %c0_13 = arith.constant 0 : index
    %30 = vector.load %arg5[%c0_12, %c0_13] : memref<1x32xf32, #tpu.memory_space<vmem>>, vector<1x32xf32>
    %31 = vector.broadcast %30 : vector<1x32xf32> to vector<2x32xf32>
    %32 = arith.addf %29, %31 : vector<2x32xf32>
    %c0_14 = arith.constant 0 : index
    %c0_15 = arith.constant 0 : index
    %33 = vector.load %arg6[%c0_14, %c0_15] : memref<2x32xf32, #tpu.memory_space<vmem>>, vector<2x32xf32>
    tpu.vector_store %arg6[%c0_14, %c0_15], %32 {strides = array<i32>} : memref<2x32xf32, #tpu.memory_space<vmem>>, vector<2x32xf32>,
    return
  }
  func.func @transform_0(%arg0: i32) -> i32 {
    %c0_i32 = arith.constant 0 : i32
    %c0_i32_0 = arith.constant 0 : i32
    return %c0_i32 : i32
  }
  func.func @transform_1(%arg0: i32) -> (i32, i32) {
    %c0_i32 = arith.constant 0 : i32
    %c0_i32_0 = arith.constant 0 : i32
    return %arg0, %c0_i32 : i32, i32
  }
  func.func @transform_2(%arg0: i32) -> (i32, i32) {
    %c0_i32 = arith.constant 0 : i32
    %c0_i32_0 = arith.constant 0 : i32
    return %arg0, %c0_i32 : i32, i32
  }
  func.func @transform_3(%arg0: i32) -> (i32, i32) {
    %c0_i32 = arith.constant 0 : i32
    %c0_i32_0 = arith.constant 0 : i32
    %c0_i32_1 = arith.constant 0 : i32
    return %c0_i32, %c0_i32_0 : i32, i32
  }
  func.func @transform_4(%arg0: i32) -> (i32, i32) {
    %c0_i32 = arith.constant 0 : i32
    %c0_i32_0 = arith.constant 0 : i32
    %c0_i32_1 = arith.constant 0 : i32
    return %c0_i32, %c0_i32_0 : i32, i32
  }
  func.func @transform_5(%arg0: i32) -> (i32, i32) {
    %c0_i32 = arith.constant 0 : i32
    %c0_i32_0 = arith.constant 0 : i32
    return %arg0, %c0_i32 : i32, i32
  }
}

</mosaic_0001>

<bundles_post_ra>
// kernel: tpu_custom_call.1
= control target key start
LH: loop header
LB: loop body
LE: loop exit
PB: predicated region body
PF: predicated region fallthrough
CT: control target
= control target key end

     0   :  { %10 = vsyncpa [#allocation5], 0  ;;  %s323_s0 = inlined_call_operand.hbm [shape: f32[2], index: 0, kind: input, shape index: {}]   ;;  %s324_s1 = inlined_call_operand.hbm [shape: f32[2,32], index: 1, kind: input, shape index: {}]   ;;  %s325_s2 = inlined_call_operand.vmem [shape: f32[2,32], index: 2, kind: input, shape index: {}]   ;;  %s326_s3 = inlined_call_operand.hbm [shape: f32[32,32], index: 3, kind: input, shape index: {}]   ;;  %s327_s4 = inlined_call_operand.vmem [shape: f32[1,32], index: 4, kind: input, shape index: {}]   ;;  %s328_s5 = inlined_call_operand.hbm [shape: f32[2,32], index: 5, kind: output, shape index: {}]  }
   0x1   :  { %11 = vsyncpa [#allocation3], 0 }
   0x2   :  { %12 = vsyncpa [#allocation8], 0 }
   0x3   :  { %13 = vsyncpa [#allocation4], 0  ;;  %s267_s18 = smov [#allocation2]   ;;  %s268_s21 = smov [#allocation6]  }
   0x4   :  { %21 = dma.hbm_to_smem %s323_s0, 16, %s267_s18, [#allocation5]  }
   0x5   :  { %s28_s22 = sshll.u32 %s268_s21, 4  ;;  %s269_s23 = smov [#allocation7]   ;;  %s29_s22 = int_to_ptr.vmem [resolvable:$true] %s28_s22 }
   0x6   :  { %s39_s24 = sshll.u32 %s269_s23, 4  ;;  %s207_s25 = scalar_lea.vmem %s29_s22, 32  ;;  %s40_s24 = int_to_ptr.vmem [resolvable:$true] %s39_s24 }
   0x7   :  { %p208_p0 = scmp.ne.s32.totalorder %s29_s22, %s207_s25  ;;  %p212_p1 = scmp.lt.s32.totalorder %s29_s22, %s29_s22 }
   0x8   :  { %p213_p2 = scmp.lt.s32.totalorder %s207_s25, %s207_s25 }
   0xa   :  { %p214_p3 = por %p213_p2, %p212_p1 }
   0xc   :  { %p215_p4 = pnand %p214_p3, %p208_p0 }
   0xe   :  { %218 = shalt.err (!%p215_p4)
}
   0xf   :  { %31 = dma.hbm_to_vmem [thread:$0]  %s324_s1, 32, %s29_s22, [#allocation3]  }
  0x10   :  { %s227_s28 = scalar_lea.vmem %s40_s24, 512  ;;  %p232_p6 = scmp.lt.s32.totalorder %s40_s24, %s40_s24 }
  0x11   :  { %p228_p5 = scmp.ne.s32.totalorder %s40_s24, %s227_s28  ;;  %p233_p7 = scmp.lt.s32.totalorder %s227_s28, %s227_s28 }
  0x13   :  { %p234_p8 = por %p233_p7, %p232_p6 }
  0x15   :  { %p235_p9 = pnand %p234_p8, %p228_p5 }
  0x17   :  { %238 = shalt.err (!%p235_p9)
}
  0x18   :  { %s270_s0 = smov 128   ;;  %s271_s29 = smov 8  }
  0x19   :  { %45 = dma.hbm_to_vmem [thread:$0]  %s326_s3, 512, %s40_s24, [#allocation8], %s270_s0, %s270_s0, %s271_s29  }
  0x1a   :  { %259 = dma.done.wait [#allocation5], 16  }
  0x1b   :  { %260 = vsyncadd [#allocation5], 4294967280 }
  0x1c   :  { %261 = dma.done.wait [#allocation3], 32  }
  0x1d   :  { %262 = vsyncadd [#allocation3], 4294967264 }
  0x1e   :  { %263 = dma.done.wait [#allocation8], 512  }
  0x1f   :  { %264 = vsyncadd [#allocation8], 4294966784 }
  0x20   :  { %57 = sfence }
  0x21   :  { %v86_v0 = vld [vmem:[#allocation7 + $0x10] sm:$0xff]  ;;  %v87_v1 = vld [vmem:[#allocation7 + $0x18] sm:$0xff]  ;;  %v84_v2 = vld [vmem:[#allocation7] sm:$0xff]  ;;  %v272_v3 = vmov 0.0   ;;  %vm273_vm0 = vmmov 0   ;;  %s59_s3 = sld [smem:[#allocation2]] }
  0x22   :  { %167 = vmatprep.subr.bf16.mxu0 %v272_v3  ;;  %v89_v4 = vpack.c.bf16 %v87_v1, %v86_v0  ;;  %v85_v5 = vld [vmem:[#allocation7 + $0x8] sm:$0xff]  ;;  %171 = vmatprep.mubr.msk.bf16.mxu0 %vm273_vm0, %v272_v3  ;;  %v62_v6 = vld [vmem:[%s325_s2] sm:$0x3]  ;;  %s160_s2 = sld [smem:[#allocation2 + $0x1]]  ;;  %vm97_vm1 = vcmask 261120   ;;  %s274_s10 = smov [#allocation9]  }
  0x23   :  { %v88_v7 = vpack.c.bf16 %v85_v5, %v84_v2  ;;  %v64_v8 = vsub.f32 1.0, %v62_v6  ;;  %v63_v10 = vadd.f32 1e-07, %v62_v6  ;;  %v61_v24 = vld [vmem:[#allocation6] sm:$0x3]  ;;  %s149_s11 = sshll.u32 %s274_s10, 4  ;;  %s150_s11 = int_to_ptr.vmem [resolvable:$true] %s149_s11 }
  0x24   :  { %168 = vmatpush3.bf16.msra.mxu0 %v89_v4  ;;  %v162_v28 = vld [vmem:[%s327_s4] ss:$0 sm:$0xff]  ;;  %vm141_vm2 = vcmask 254976   ;;  %s239_s12 = scalar_lea.vmem %s150_s11, 32  ;;  %p244_p11 = scmp.lt.s32.totalorder %s150_s11, %s150_s11 }
  0x25   :  { %169 = vmatprep.subr.bf16.mxu0 %v272_v3  ;;  %v65_v9 = vadd.f32 1e-07, %v64_v8  ;;  %p240_p10 = scmp.ne.s32.totalorder %s150_s11, %s239_s12  ;;  %p245_p12 = scmp.lt.s32.totalorder %s239_s12, %s239_s12 }
  0x27   :  { %183 = vrcp.f32 %v65_v9  ;;  %v70_v14 = vstv %s59_s3  ;;  %p246_p13 = por %p245_p12, %p244_p11 }
  0x28   :  { %170 = vmatpush3.bf16.msra.mxu0 %v88_v7  ;;  %v80_v22 = vstv %s160_s2 }
  0x29   :  { %p247_p0 = pnand %p246_p13, %p240_p10 }
  0x34   :  { %v184_v11 = vpop.eup %183 }
  0x35   :  { %v67_v12 = vmul.f32 %v184_v11, %v63_v10 }
  0x37   :  { %185 = vlog2.f32 %v67_v12 }
  0x44   :  { %v186_v13 = vpop.eup %185 }
  0x45   :  { %v69_v15 = vmul.f32 0.6931472, %v186_v13 }
  0x47   :  { %v71_v16 = vadd.f32 %v70_v14, %v69_v15 }
  0x49   :  { %v161_v17 = vmul.f32 -10.0, %v71_v16 }
  0x4b   :  { %v74_v18 = vmul.f32 1.442695, %v161_v17 }
  0x4d   :  { %187 = vpow2.f32 %v74_v18 }
  0x5a   :  { %v188_v19 = vpop.eup %187 }
  0x5b   :  { %v76_v20 = vadd.f32 1.0, %v188_v19 }
  0x5d   :  { %189 = vrcp.f32 %v76_v20 }
  0x6a   :  { %v190_v21 = vpop.eup %189 }
  0x6b   :  { %v79_v23 = vsub.f32 1.0, %v190_v21 }
  0x6d   :  { %v81_v25 = vmul.f32 %v80_v22, %v79_v23 }
  0x6f   :  { %v82_v26 = vmul.f32 %v81_v25, %v61_v24 }
  0x71   :  { %v83_v27 = vpack.c.bf16 %v82_v26, %v82_v26 }
  0x73   :  { %172 = vmatmul.mubr.msk.bf16.vlgmr.msra.gmra.mxu0 %vm97_vm1, %v83_v27 }
 0x133   :  { %v135_v29 = vpop.f32.mrf.mxu0 }
 0x134   :  { %v136_v30 = vadd.f32 %v162_v28, %v135_v29 }
 0x135   :  { %v173_v31 = vpop.f32.mrf.mxu0 }
 0x136   :  { %142 = vst.msk [vmem:[#allocation9] sm:$0x3] %vm141_vm2, %v136_v30 }
 0x137   :  { %v138_v32 = vpop.f32.mrf.mxu0 }
 0x138   :  { %250 = shalt.err (!%p247_p0)
}
 0x139   :  { %152 = dma.vmem_to_hbm [thread:$0]  %s150_s11, 32, %s328_s5, [#allocation4]   ;;  %v174_v33 = vpop.f32.mrf.mxu0 }
 0x13a   :  { %265 = dma.done.wait [#allocation4], 32  }
 0x13b   :  { %266 = vsyncadd [#allocation4], 4294967264 }
 0x13c   :  { %156 = vsyncpa [#allocation3], 1 }
 0x13d   :  { %157 = vsyncpa [#allocation8], 1 }
 0x13e   :  { %158 = vsyncpa [#allocation4], 1 }
 0x13f   :  { %159 = vsyncpa [#allocation5], 1 }

</bundles_post_ra>
